<compile_context>
chip_gen: v6e
topology: v6e:2x2x1
jax: 0.10.0
libtpu: 0.0.40
codegen_flags: <defaults>
</compile_context>

<pallas_src>
import jax
import jax.numpy as jnp
import numpy as np
from jax.experimental import pallas as pl
from jax.experimental.pallas import tpu as pltpu

SMOOTH = 1.0
_LANE = 128


def _ceil_to(x, m):
    return -(-x // m) * m


def _pick_row_tile(R, N, C, pred_itemsize, tgt_itemsize):
    """Tile size (in 128-lane rows) of the flattened spatial axis."""
    # Sublane alignment keeping both operands natively packed
    # (f32/int32 -> 8 rows, bf16 -> 16, int8 -> 32).
    align = max(8, 32 // pred_itemsize, 32 // tgt_itemsize)
    if R <= align:
        return R                                   # one full-extent block (full-dim exemption)
    pred_row = _LANE * N * C * pred_itemsize       # predict bytes per chunk-row
    tgt_row = _LANE * N * tgt_itemsize             # target bytes per chunk-row
    # VMEM model: 2x double-buffered input blocks + ~4 tile-sized elementwise
    # temporaries (class mask, masked select, mask->f32, square) in the body.
    per_row = 2 * (pred_row + tgt_row) + 4 * pred_row
    budget = 26 << 20                              # fits v5e/v6e/v7x scoped VMEM
    rt = min(budget // per_row, (8 << 20) // max(1, pred_row))  # predict tile <= 8 MiB
    rt = max(align, (rt // align) * align)
    # Keep >= 2 grid steps so the "parallel" axis can shard across v7x's 2 TCs.
    half = _ceil_to(-(-R // 2), align)
    return max(align, min(rt, half))


def _make_dice_kernel(R, rt, T, needs_mask):
    def _sum_rows_f32(x):
        # Reduce the trailing (rows, 128) dims, accumulating in f32.
        return jnp.sum(jnp.sum(x.astype(jnp.float32), axis=-1), axis=-1)

    def kernel(pred_ref, tgt_ref, out_ref):
        def emit(valid):
            pred = pred_ref[...]                        # (N, C, rt, 128), native dtype
            tgt = tgt_ref[...].astype(jnp.int32)        # (N, rt, 128), widened in-reg
            C = pred.shape[1]
            if valid is not None:
                # Zero rows beyond the true spatial extent (ragged last tile).
                pred = jnp.where(valid[None, None], pred, jnp.zeros_like(pred))
            # Class axis is a leading (untiled) dim -> this iota is a constant
            # splat per class slice, not a per-element lane/sublane stream.
            cls = jax.lax.broadcasted_iota(jnp.int32, (1, C, 1, 1), 1)
            mask = tgt[:, None] == cls                  # (N, C, rt, 128) one-hot mask
            if valid is not None:
                mask = jnp.logical_and(mask, valid[None, None])
            num = _sum_rows_f32(jnp.where(mask, pred, jnp.zeros_like(pred)))   # (N, C)
            cnt = _sum_rows_f32(mask)                                          # (N, C) = sum t^2
            den = _sum_rows_f32(pred * pred) + cnt                             # (N, C)
            # Both partials live in one packed output block -> a single
            # writeback DMA per grid step (two tiny vsts fill it).
            out_ref[0, 0] = num
            out_ref[0, 1] = den

        if not needs_mask:
            emit(None)
        else:
            t = pl.program_id(0)

            @pl.when(t < T - 1)
            def _():
                emit(None)

            @pl.when(t == T - 1)
            def _():
                row = jax.lax.broadcasted_iota(jnp.int32, (rt, _LANE), 0)
                emit((T - 1) * rt + row < R)

    return kernel


def hard_dice_loss(predict, target, n_class=None):
    """predict: (N, C, H, W) float; target: (N, H, W) integer class map."""
    N, C, H, W = predict.shape
    if n_class is None:
        n_class = C
    # The PyTorch module one-hots target to n_class channels and asserts that
    # it matches predict's channel dim.
    assert C == n_class, "predict & target shape don't match"
    S = H * W

    # Keep integer targets narrow in HBM (bandwidth win); widen inside the
    # kernel.  Only cast when the dtype is something the kernel can't take.
    if target.dtype.name not in ("int8", "uint8", "int32", "uint32"):
        target = target.astype(jnp.int32)

    pred = predict.reshape(N, C, S)        # contiguous views, no HBM copy
    tgt = target.reshape(N, S)

    S128 = _ceil_to(S, _LANE)
    if S128 != S:
        # Rare fallback (S not a multiple of 128): minimal pad so the spatial
        # axis can be viewed as (rows, 128).  Zero predict (adds 0 to num and
        # p^2); pad target with an out-of-range class (adds 0 to the count).
        pred = jnp.pad(pred, ((0, 0), (0, 0), (0, S128 - S)))
        tgt = jnp.pad(tgt, ((0, 0), (0, S128 - S)), constant_values=n_class)
    R = S128 // _LANE

    # Lane/sublane-dense views: trailing block dims are (rows, 128).
    pred = pred.reshape(N, C, R, _LANE)
    tgt = tgt.reshape(N, R, _LANE)

    pred_isz = pred.dtype.itemsize
    tgt_isz = tgt.dtype.itemsize
    rt = _pick_row_tile(R, N, C, pred_isz, tgt_isz)
    T = -(-R // rt)
    needs_mask = (R % rt) != 0

    # TODO(synk): for very large N*C (predict row > 8 MiB) also tile the batch
    # axis; current design only tiles the spatial axis.
    pred_tile = N * C * rt * _LANE * pred_isz
    tgt_tile = N * rt * _LANE * tgt_isz
    vmem_need = 2 * (pred_tile + tgt_tile) + 4 * pred_tile + (2 << 20)
    vmem_limit = int(min(30 << 20, max(16 << 20, vmem_need)))

    cost = pl.CostEstimate(
        flops=6 * N * C * S128,
        transcendentals=0,
        bytes_accessed=int(pred.size * pred_isz + tgt.size * tgt_isz + T * 2 * N * C * 4),
    )

    parts = pl.pallas_call(
        _make_dice_kernel(R, rt, T, needs_mask),
        out_shape=jax.ShapeDtypeStruct((T, 2, N, C), jnp.float32),
        grid_spec=pltpu.PrefetchScalarGridSpec(
            num_scalar_prefetch=0,
            grid=(T,),
            in_specs=[
                pl.BlockSpec((N, C, rt, _LANE), lambda t: (0, 0, t, 0)),  # predict row-tile
                pl.BlockSpec((N, rt, _LANE), lambda t: (0, t, 0)),        # target row-tile
            ],
            out_specs=pl.BlockSpec((1, 2, N, C), lambda t: (t, 0, 0, 0)), # packed partials
        ),
        compiler_params=pltpu.CompilerParams(
            dimension_semantics=("parallel",),   # independent tiles -> megacore on v7x
            vmem_limit_bytes=vmem_limit,
        ),
        cost_estimate=cost,
    )(pred, tgt)

    # Tiny (T, 2, N, C) epilogue in plain JAX.
    sums = jnp.sum(parts, axis=0)                      # (2, N, C)
    num = sums[0] + SMOOTH
    den = sums[1] + SMOOTH
    per_class = jnp.mean(1.0 - num / den, axis=0)      # (C,) mean over batch
    return jnp.sum(per_class) / n_class


def _reference(predict, target, n_class):
    # Plain-JAX reference mirroring the PyTorch module.
    N, C, H, W = predict.shape
    onehot = jax.nn.one_hot(target, n_class, axis=1, dtype=jnp.float32)  # (N,C,H,W)
    total = 0.0
    for i in range(C):
        p = predict[:, i].reshape(N, -1).astype(jnp.float32)
        t = onehot[:, i].reshape(N, -1)
        num = jnp.sum(p * t, axis=1) + SMOOTH
        den = jnp.sum(p * p + t * t, axis=1) + SMOOTH
        total = total + jnp.mean(1.0 - num / den)
    return total / C


if __name__ == "__main__":
    key = jax.random.PRNGKey(0)
    k1, k2, k3, k4 = jax.random.split(key, 4)
    N, C = 2, 4

    # Case 1: S = 16*16 = 256 (multiple of 128 -> no padding, single block).
    H, W = 16, 16
    predict = jax.nn.softmax(jax.random.normal(k1, (N, C, H, W), jnp.float32), axis=1)
    target = jax.random.randint(k2, (N, H, W), 0, C, jnp.int32)
    loss = jax.block_until_ready(hard_dice_loss(predict, target, n_class=C))
    ref = _reference(predict, target, C)
    assert np.allclose(np.asarray(loss), np.asarray(ref), rtol=1e-5, atol=1e-5), (loss, ref)

    # Case 2: S = 36*36 = 1296 (not a multiple of 128 -> exercises the minimal
    # 128-pad plus the in-kernel validity mask on the ragged last row-tile).
    H2, W2 = 36, 36
    predict2 = jax.nn.softmax(jax.random.normal(k3, (N, C, H2, W2), jnp.float32), axis=1)
    target2 = jax.random.randint(k4, (N, H2, W2), 0, C, jnp.int32)
    loss2 = jax.block_until_ready(hard_dice_loss(predict2, target2, n_class=C))
    ref2 = _reference(predict2, target2, C)
    assert np.allclose(np.asarray(loss2), np.asarray(ref2), rtol=1e-5, atol=1e-5), (loss2, ref2)

    print("KERNEL_OK")
</pallas_src>

<mosaic_0001>
module attributes {stable_mosaic.version = 11 : i64} {
  func.func @kernel(%arg0: i32, %arg1: memref<2x4x2x128xf32, #tpu.memory_space<vmem>>, %arg2: memref<2x2x128xi32, #tpu.memory_space<vmem>>, %arg3: memref<1x2x2x4xf32, #tpu.memory_space<vmem>>) attributes {dimension_semantics = [#tpu.dimension_semantics<parallel>], iteration_bounds = array<i64: 1>, scalar_prefetch = 0 : i64, scratch_operands = 0 : i64, tpu.core_type = #tpu.core_type<tc>, window_params = [{transform_indices = @transform_0, window_bounds = array<i64: 2, 4, 2, 128>}, {transform_indices = @transform_1, window_bounds = array<i64: 2, 2, 128>}, {transform_indices = @transform_2, window_bounds = array<i64: 1, 2, 2, 4>}]} {
    %c0 = arith.constant 0 : index
    %c0_0 = arith.constant 0 : index
    %c0_1 = arith.constant 0 : index
    %c0_2 = arith.constant 0 : index
    %0 = vector.load %arg1[%c0, %c0_0, %c0_1, %c0_2] : memref<2x4x2x128xf32, #tpu.memory_space<vmem>>, vector<2x4x2x128xf32>
    %c0_3 = arith.constant 0 : index
    %c0_4 = arith.constant 0 : index
    %c0_5 = arith.constant 0 : index
    %1 = vector.load %arg2[%c0_3, %c0_4, %c0_5] : memref<2x2x128xi32, #tpu.memory_space<vmem>>, vector<2x2x128xi32>
    %2 = tpu.iota {dimensions = array<i32: 1>} : vector<1x4x1x1xi32>
    %3 = vector.shape_cast %1 : vector<2x2x128xi32> to vector<2x1x2x128xi32>
    %4 = vector.broadcast %3 : vector<2x1x2x128xi32> to vector<2x4x2x128xi32>
    %5 = vector.broadcast %2 : vector<1x4x1x1xi32> to vector<2x4x2x128xi32>
    %6 = arith.cmpi eq, %4, %5 : vector<2x4x2x128xi32>
    %cst = arith.constant 0.000000e+00 : f32
    %7 = vector.broadcast %cst : f32 to vector<2x4x2x128xf32>
    %8 = arith.select %6, %0, %7 : vector<2x4x2x128xi1>, vector<2x4x2x128xf32>
    %cst_6 = arith.constant dense<0.000000e+00> : vector<2x4x2xf32>
    %9 = vector.multi_reduction <add>, %8, %cst_6 [3] : vector<2x4x2x128xf32> to vector<2x4x2xf32>
    %cst_7 = arith.constant dense<0.000000e+00> : vector<2x4xf32>
    %10 = vector.multi_reduction <add>, %9, %cst_7 [2] : vector<2x4x2xf32> to vector<2x4xf32>
    %11 = arith.extui %6 : vector<2x4x2x128xi1> to vector<2x4x2x128xi32>
    %12 = arith.sitofp %11 : vector<2x4x2x128xi32> to vector<2x4x2x128xf32>
    %cst_8 = arith.constant dense<0.000000e+00> : vector<2x4x2xf32>
    %13 = vector.multi_reduction <add>, %12, %cst_8 [3] : vector<2x4x2x128xf32> to vector<2x4x2xf32>
    %cst_9 = arith.constant dense<0.000000e+00> : vector<2x4xf32>
    %14 = vector.multi_reduction <add>, %13, %cst_9 [2] : vector<2x4x2xf32> to vector<2x4xf32>
    %15 = arith.mulf %0, %0 : vector<2x4x2x128xf32>
    %cst_10 = arith.constant dense<0.000000e+00> : vector<2x4x2xf32>
    %16 = vector.multi_reduction <add>, %15, %cst_10 [3] : vector<2x4x2x128xf32> to vector<2x4x2xf32>
    %cst_11 = arith.constant dense<0.000000e+00> : vector<2x4xf32>
    %17 = vector.multi_reduction <add>, %16, %cst_11 [2] : vector<2x4x2xf32> to vector<2x4xf32>
    %18 = arith.addf %17, %14 : vector<2x4xf32>
    %c0_12 = arith.constant 0 : index
    %c0_13 = arith.constant 0 : index
    %c0_14 = arith.constant 0 : index
    %c0_15 = arith.constant 0 : index
    %19 = vector.load %arg3[%c0_12, %c0_13, %c0_14, %c0_15] : memref<1x2x2x4xf32, #tpu.memory_space<vmem>>, vector<1x1x2x4xf32>
    %20 = vector.shape_cast %19 : vector<1x1x2x4xf32> to vector<2x4xf32>
    %21 = vector.shape_cast %10 : vector<2x4xf32> to vector<1x1x2x4xf32>
    tpu.vector_store %arg3[%c0_12, %c0_13, %c0_14, %c0_15], %21 {strides = array<i32>} : memref<1x2x2x4xf32, #tpu.memory_space<vmem>>, vector<1x1x2x4xf32>,
    %c0_16 = arith.constant 0 : index
    %c1 = arith.constant 1 : index
    %c0_17 = arith.constant 0 : index
    %c0_18 = arith.constant 0 : index
    %22 = vector.load %arg3[%c0_16, %c1, %c0_17, %c0_18] : memref<1x2x2x4xf32, #tpu.memory_space<vmem>>, vector<1x1x2x4xf32>
    %23 = vector.shape_cast %22 : vector<1x1x2x4xf32> to vector<2x4xf32>
    %24 = vector.shape_cast %18 : vector<2x4xf32> to vector<1x1x2x4xf32>
    tpu.vector_store %arg3[%c0_16, %c1, %c0_17, %c0_18], %24 {strides = array<i32>} : memref<1x2x2x4xf32, #tpu.memory_space<vmem>>, vector<1x1x2x4xf32>,
    return
  }
  func.func @transform_0(%arg0: i32) -> (i32, i32, i32, i32) {
    %c0_i32 = arith.constant 0 : i32
    %c0_i32_0 = arith.constant 0 : i32
    %c0_i32_1 = arith.constant 0 : i32
    %c0_i32_2 = arith.constant 0 : i32
    return %c0_i32, %c0_i32_0, %arg0, %c0_i32_1 : i32, i32, i32, i32
  }
  func.func @transform_1(%arg0: i32) -> (i32, i32, i32) {
    %c0_i32 = arith.constant 0 : i32
    %c0_i32_0 = arith.constant 0 : i32
    %c0_i32_1 = arith.constant 0 : i32
    return %c0_i32, %arg0, %c0_i32_0 : i32, i32, i32
  }
  func.func @transform_2(%arg0: i32) -> (i32, i32, i32, i32) {
    %c0_i32 = arith.constant 0 : i32
    %c0_i32_0 = arith.constant 0 : i32
    %c0_i32_1 = arith.constant 0 : i32
    %c0_i32_2 = arith.constant 0 : i32
    return %arg0, %c0_i32, %c0_i32_0, %c0_i32_1 : i32, i32, i32, i32
  }
}

</mosaic_0001>

<bundles_post_ra>
// kernel: tpu_custom_call.1
= control target key start
LH: loop header
LB: loop body
LE: loop exit
PB: predicated region body
PF: predicated region fallthrough
CT: control target
= control target key end

     0   :  { %7 = vsyncpa [#allocation3], 0  ;;  %s622_s0 = inlined_call_operand.hbm [shape: f32[2,4,2,128], index: 0, kind: input, shape index: {}]   ;;  %s623_s1 = inlined_call_operand.hbm [shape: s32[2,2,128], index: 1, kind: input, shape index: {}]   ;;  %s624_s2 = inlined_call_operand.hbm [shape: f32[1,2,2,4], index: 2, kind: output, shape index: {}]  }
   0x1   :  { %8 = vsyncpa [#allocation6], 0 }
   0x2   :  { %9 = vsyncpa [#allocation4], 0  ;;  %s459_s9 = smov [#allocation2]  }
   0x3   :  { %s15_s10 = sshll.u32 %s459_s9, 4  ;;  %s16_s10 = int_to_ptr.vmem [resolvable:$true] %s15_s10 }
   0x4   :  { %s401_s11 = scalar_lea.vmem %s16_s10, 256  ;;  %p406_p1 = scmp.lt.s32.totalorder %s16_s10, %s16_s10 }
   0x5   :  { %p402_p0 = scmp.ne.s32.totalorder %s16_s10, %s401_s11  ;;  %p407_p2 = scmp.lt.s32.totalorder %s401_s11, %s401_s11 }
   0x7   :  { %p408_p3 = por %p407_p2, %p406_p1 }
   0x9   :  { %p409_p4 = pnand %p408_p3, %p402_p0 }
   0xb   :  { %412 = shalt.err (!%p409_p4)
}
   0xc   :  { %s460_s12 = smov 32   ;;  %s461_s13 = smov 2  }
   0xd   :  { %21 = dma.hbm_to_vmem [thread:$0]  %s622_s0, 256, %s16_s10, [#allocation3], %s460_s12, %s460_s12, %s461_s13  }
   0xe   :  { %s462_s16 = smov [#allocation5]  }
   0xf   :  { %s27_s17 = sshll.u32 %s462_s16, 4  ;;  %s28_s17 = int_to_ptr.vmem [resolvable:$true] %s27_s17 }
  0x10   :  { %s421_s18 = scalar_lea.vmem %s28_s17, 64  ;;  %p426_p6 = scmp.lt.s32.totalorder %s28_s17, %s28_s17 }
  0x11   :  { %p422_p5 = scmp.ne.s32.totalorder %s28_s17, %s421_s18  ;;  %p427_p7 = scmp.lt.s32.totalorder %s421_s18, %s421_s18 }
  0x13   :  { %p428_p8 = por %p427_p7, %p426_p6 }
  0x15   :  { %p429_p9 = pnand %p428_p8, %p422_p5 }
  0x17   :  { %432 = shalt.err (!%p429_p9)
}
  0x18   :  { %33 = dma.hbm_to_vmem [thread:$0]  %s623_s1, 64, %s28_s17, [#allocation6], %s460_s12, %s460_s12, %s461_s13  }
  0x19   :  { %453 = dma.done.wait [#allocation3], 256  }
  0x1a   :  { %454 = vsyncadd [#allocation3], 4294967040 }
  0x1b   :  { %455 = dma.done.wait [#allocation6], 64  }
  0x1c   :  { %456 = vsyncadd [#allocation6], 4294967232  ;;  %v492_v0 = vld [vmem:[#allocation5 + $0x2] sm:$0x3]  ;;  %vm66_vm0 = vcmask 1041408   ;;  %v463_v3 = vmov 0.0  }
  0x1d   :  { %v494_v1 = vld [vmem:[#allocation5] sm:$0x3]  ;;  %vm54_vm1 = vcmp.eq.s32.totalorder %v492_v0, 0  ;;  %vm55_vm3 = vcmp.eq.s32.totalorder %v492_v0, 1  ;;  %v41_v2 = vld [vmem:[#allocation2 + $0x2] sm:$0x3] }
  0x1e   :  { %vm50_vm2 = vcmp.eq.s32.totalorder %v494_v1, 0  ;;  %vm51_vm4 = vcmp.eq.s32.totalorder %v494_v1, 1  ;;  %v383_v4 = vsel %vm54_vm1, 1.0, %v463_v3  ;;  %v384_v6 = vsel %vm55_vm3, 1.0, %v463_v3  ;;  %v40_v8 = vld [vmem:[#allocation2] sm:$0x3] }
  0x1f   :  { %v379_v5 = vsel %vm50_vm2, 1.0, %v463_v3  ;;  %v380_v7 = vsel %vm51_vm4, 1.0, %v463_v3  ;;  %v179_v9 = vsel %vm66_vm0, %v383_v4, 0.0  ;;  %v182_v11 = vsel %vm66_vm0, %v384_v6, 0.0  ;;  %v45_v15 = vld [vmem:[#allocation2 + $0xa] sm:$0x3] }
  0x20   :  { %v167_v10 = vsel %vm66_vm0, %v379_v5, 0.0  ;;  %180 = vadd.xlane.f32.xlu1 %v179_v9  ;;  %v170_v12 = vsel %vm66_vm0, %v380_v7, 0.0  ;;  %v246_v13 = vmul.f32 %v41_v2, %v41_v2  ;;  %v245_v14 = vmul.f32 %v40_v8, %v40_v8  ;;  %v44_v16 = vld [vmem:[#allocation2 + $0x8] sm:$0x3]  ;;  %v46_v25 = vld [vmem:[#allocation2 + $0xc] sm:$0x3] }
  0x21   :  { %168 = vadd.xlane.f32.xlu0 %v167_v10  ;;  %v250_v19 = vmul.f32 %v45_v15, %v45_v15  ;;  %v249_v20 = vmul.f32 %v44_v16, %v44_v16  ;;  %vm56_vm5 = vcmp.eq.s32.totalorder %v492_v0, 2  ;;  %vm52_vm6 = vcmp.eq.s32.totalorder %v494_v1, 2  ;;  %v42_v26 = vld [vmem:[#allocation2 + $0x4] sm:$0x3]  ;;  %v47_v43 = vld [vmem:[#allocation2 + $0xe] sm:$0x3] }
  0x22   :  { %v256_v17 = vsel %vm66_vm0, %v246_v13, 0.0  ;;  %v253_v18 = vsel %vm66_vm0, %v245_v14, 0.0  ;;  %v385_v23 = vsel %vm56_vm5, 1.0, %v463_v3  ;;  %v381_v24 = vsel %vm52_vm6, 1.0, %v463_v3  ;;  %v43_v44 = vld [vmem:[#allocation2 + $0x6] sm:$0x3] }
  0x23   :  { %v268_v21 = vsel %vm66_vm0, %v250_v19, 0.0  ;;  %v265_v22 = vsel %vm66_vm0, %v249_v20, 0.0  ;;  %v185_v27 = vsel %vm66_vm0, %v385_v23, 0.0  ;;  %v173_v28 = vsel %vm66_vm0, %v381_v24, 0.0  ;;  %s464_s0 = smov [#allocation7]  }
  0x24   :  { %183 = vadd.xlane.f32.xlu1 %v182_v11  ;;  %v251_v29 = vmul.f32 %v46_v25, %v46_v25  ;;  %v247_v30 = vmul.f32 %v42_v26, %v42_v26  ;;  %v59_v33 = vsel %vm51_vm4, %v41_v2, 0.0  ;;  %v58_v34 = vsel %vm50_vm2, %v40_v8, 0.0  ;;  %s366_s1 = sshll.u32 %s464_s0, 4  ;;  %s367_s1 = int_to_ptr.vmem [resolvable:$true] %s366_s1 }
  0x25   :  { %171 = vadd.xlane.f32.xlu0 %v170_v12  ;;  %v70_v35 = vsel %vm66_vm0, %v59_v33, 0.0  ;;  %v67_v36 = vsel %vm66_vm0, %v58_v34, 0.0  ;;  %v63_v37 = vsel %vm55_vm3, %v45_v15, 0.0  ;;  %v62_v38 = vsel %vm54_vm1, %v44_v16, 0.0  ;;  %s433_s21 = scalar_lea.vmem %s367_s1, 64  ;;  %p438_p11 = scmp.lt.s32.totalorder %s367_s1, %s367_s1 }
  0x26   :  { %v271_v31 = vsel %vm66_vm0, %v251_v29, 0.0  ;;  %v259_v32 = vsel %vm66_vm0, %v247_v30, 0.0  ;;  %vm57_vm7 = vcmp.eq.s32.totalorder %v492_v0, 3  ;;  %vm53_vm8 = vcmp.eq.s32.totalorder %v494_v1, 3  ;;  %p434_p10 = scmp.ne.s32.totalorder %s367_s1, %s433_s21  ;;  %p439_p12 = scmp.lt.s32.totalorder %s433_s21, %s433_s21 }
  0x27   :  { %v82_v39 = vsel %vm66_vm0, %v63_v37, 0.0  ;;  %v79_v40 = vsel %vm66_vm0, %v62_v38, 0.0  ;;  %v386_v41 = vsel %vm57_vm7, 1.0, %v463_v3  ;;  %v382_v42 = vsel %vm53_vm8, 1.0, %v463_v3 }
  0x28   :  { %257 = vadd.xlane.f32.xlu1 %v256_v17  ;;  %v188_v45 = vsel %vm66_vm0, %v386_v41, 0.0  ;;  %v176_v46 = vsel %vm66_vm0, %v382_v42, 0.0  ;;  %v252_v47 = vmul.f32 %v47_v43, %v47_v43  ;;  %v248_v48 = vmul.f32 %v43_v44, %v43_v44  ;;  %p440_p13 = por %p439_p12, %p438_p11 }
  0x29   :  { %254 = vadd.xlane.f32.xlu0 %v253_v18  ;;  %v64_v51 = vsel %vm56_vm5, %v46_v25, 0.0  ;;  %v60_v52 = vsel %vm52_vm6, %v42_v26, 0.0  ;;  %v65_v55 = vsel %vm57_vm7, %v47_v43, 0.0  ;;  %v61_v56 = vsel %vm53_vm8, %v43_v44, 0.0 }
  0x2a   :  { %v274_v49 = vsel %vm66_vm0, %v252_v47, 0.0  ;;  %v262_v50 = vsel %vm66_vm0, %v248_v48, 0.0  ;;  %v85_v53 = vsel %vm66_vm0, %v64_v51, 0.0  ;;  %v73_v54 = vsel %vm66_vm0, %v60_v52, 0.0  ;;  %p441_p0 = pnand %p440_p13, %p434_p10 }
  0x2b   :  { %v88_v57 = vsel %vm66_vm0, %v65_v55, 0.0  ;;  %v76_v58 = vsel %vm66_vm0, %v61_v56, 0.0  ;;  %v99_v1 = vlaneseq  ;;  %vm133_vm9 = vcmask 1041409  }
  0x2c   :  { %269 = vadd.xlane.f32.xlu1 %v268_v21  ;;  %vm135_vm10 = vcmask 1042434   ;;  %vm137_vm11 = vcmask 1043459   ;;  %vm144_vm12 = vcmask 11264   ;;  %vm345_vm13 = vcmask 25600  }
  0x2d   :  { %266 = vadd.xlane.f32.xlu0 %v265_v22  ;;  %v100_v8 = vand.u32 127, %v99_v1  ;;  %v102_v9 = vshrl.u32 %v99_v1, 7 }
  0x2f   :  { %v560_v12 = vsub.s32 %v100_v8, %v102_v9 }
  0x30   :  { %186 = vadd.xlane.f32.xlu1 %v185_v27 }
  0x31   :  { %174 = vadd.xlane.f32.xlu0 %v173_v28 }
  0x34   :  { %272 = vadd.xlane.f32.xlu1 %v271_v31 }
  0x35   :  { %260 = vadd.xlane.f32.xlu0 %v259_v32 }
  0x38   :  { %71 = vadd.xlane.f32.xlu1 %v70_v35 }
  0x39   :  { %68 = vadd.xlane.f32.xlu0 %v67_v36 }
  0x3c   :  { %83 = vadd.xlane.f32.xlu1 %v82_v39 }
  0x3d   :  { %80 = vadd.xlane.f32.xlu0 %v79_v40 }
  0x40   :  { %189 = vadd.xlane.f32.xlu1 %v188_v45 }
  0x41   :  { %177 = vadd.xlane.f32.xlu0 %v176_v46 }
  0x44   :  { %275 = vadd.xlane.f32.xlu1 %v274_v49 }
  0x45   :  { %263 = vadd.xlane.f32.xlu0 %v262_v50 }
  0x48   :  { %86 = vadd.xlane.f32.xlu1 %v85_v53 }
  0x49   :  { %74 = vadd.xlane.f32.xlu0 %v73_v54 }
  0x4c   :  { %89 = vadd.xlane.f32.xlu1 %v88_v57 }
  0x4d   :  { %77 = vadd.xlane.f32.xlu0 %v76_v58 }
  0xa9   :  { %v181_v59 = vpop.xlane.xlu1 %180 }
  0xaa   :  { %v169_v60 = vpop.xlane.xlu0 %168  ;;  %v218_v17 = vrot.slane %v181_v59, %v560_v12 }
  0xab   :  { %v202_v18 = vrot.slane %v169_v60, %v560_v12 }
  0xad   :  { %v184_v61 = vpop.xlane.xlu1 %183 }
  0xae   :  { %v172_v62 = vpop.xlane.xlu0 %171  ;;  %v222_v13 = vrot.slane %v184_v61, %v560_v12 }
  0xaf   :  { %v206_v14 = vrot.slane %v172_v62, %v560_v12 }
  0xb0   :  { %v234_v21 = vsel %vm133_vm9, %v222_v13, %v218_v17 }
  0xb1   :  { %v258_v63 = vpop.xlane.xlu1 %257  ;;  %v231_v22 = vsel %vm133_vm9, %v206_v14, %v202_v18 }
  0xb2   :  { %v255_v2 = vpop.xlane.xlu0 %254  ;;  %v292_v23 = vrot.slane %v258_v63, %v560_v12 }
  0xb3   :  { %v288_v24 = vrot.slane %v255_v2, %v560_v12 }
  0xb5   :  { %v270_v3 = vpop.xlane.xlu1 %269  ;;  %v317_v37 = vsel %vm133_vm9, %v292_v23, %v288_v24 }
  0xb6   :  { %v267_v0 = vpop.xlane.xlu0 %266  ;;  %v308_v27 = vrot.slane %v270_v3, %v560_v12 }
  0xb7   :  { %v304_v28 = vrot.slane %v267_v0, %v560_v12 }
  0xb9   :  { %v187_v4 = vpop.xlane.xlu1 %186  ;;  %v320_v42 = vsel %vm133_vm9, %v308_v27, %v304_v28 }
  0xba   :  { %v175_v5 = vpop.xlane.xlu0 %174  ;;  %v226_v19 = vrot.slane %v187_v4, %v560_v12 }
  0xbb   :  { %v210_v20 = vrot.slane %v175_v5, %v560_v12 }
  0xbc   :  { %v235_v33 = vsel %vm135_vm10, %v226_v19, %v234_v21 }
  0xbd   :  { %v273_v6 = vpop.xlane.xlu1 %272  ;;  %v232_v34 = vsel %vm135_vm10, %v210_v20, %v231_v22 }
  0xbe   :  { %v261_v7 = vpop.xlane.xlu0 %260  ;;  %v312_v31 = vrot.slane %v273_v6, %v560_v12 }
  0xbf   :  { %v296_v32 = vrot.slane %v261_v7, %v560_v12 }
  0xc0   :  { %v321_v45 = vsel %vm135_vm10, %v312_v31, %v320_v42 }
  0xc1   :  { %v72_v10 = vpop.xlane.xlu1 %71  ;;  %v318_v46 = vsel %vm135_vm10, %v296_v32, %v317_v37 }
  0xc2   :  { %v69_v11 = vpop.xlane.xlu0 %68  ;;  %v108_v49 = vrot.slane %v72_v10, %v560_v12 }
  0xc3   :  { %v104_v54 = vrot.slane %v69_v11, %v560_v12 }
  0xc5   :  { %v84_v15 = vpop.xlane.xlu1 %83  ;;  %v134_v61 = vsel %vm133_vm9, %v108_v49, %v104_v54 }
  0xc6   :  { %v81_v16 = vpop.xlane.xlu0 %80  ;;  %v124_v55 = vrot.slane %v84_v15, %v560_v12 }
  0xc7   :  { %v120_v56 = vrot.slane %v81_v16, %v560_v12 }
  0xc9   :  { %v190_v25 = vpop.xlane.xlu1 %189  ;;  %v139_v62 = vsel %vm133_vm9, %v124_v55, %v120_v56 }
  0xca   :  { %v178_v26 = vpop.xlane.xlu0 %177  ;;  %v230_v29 = vrot.slane %v190_v25, %v560_v12 }
  0xcb   :  { %v214_v30 = vrot.slane %v178_v26, %v560_v12 }
  0xcc   :  { %v236_v35 = vsel %vm137_vm11, %v230_v29, %v235_v33 }
  0xcd   :  { %v233_v36 = vsel %vm137_vm11, %v214_v30, %v232_v34  ;;  %v276_v38 = vpop.xlane.xlu1 %275  ;;  %v242_v40 = vsel %vm144_vm12, %v236_v35, 0.0 }
  0xce   :  { %v264_v39 = vpop.xlane.xlu0 %263  ;;  %v239_v41 = vsel %vm144_vm12, %v233_v36, 0.0  ;;  %v316_v43 = vrot.slane %v276_v38, %v560_v12  ;;  %243 = vadd.xlane.f32.xlu1 %v242_v40 }
  0xcf   :  { %v300_v44 = vrot.slane %v264_v39, %v560_v12  ;;  %240 = vadd.xlane.f32.xlu0 %v239_v41 }
  0xd0   :  { %v322_v47 = vsel %vm137_vm11, %v316_v43, %v321_v45 }
  0xd1   :  { %v319_v48 = vsel %vm137_vm11, %v300_v44, %v318_v46  ;;  %v87_v50 = vpop.xlane.xlu1 %86  ;;  %v328_v52 = vsel %vm144_vm12, %v322_v47, 0.0 }
  0xd2   :  { %v75_v51 = vpop.xlane.xlu0 %74  ;;  %v325_v53 = vsel %vm144_vm12, %v319_v48, 0.0  ;;  %329 = vadd.xlane.f32.xlu1 %v328_v52  ;;  %v128_v57 = vrot.slane %v87_v50, %v560_v12 }
  0xd3   :  { %326 = vadd.xlane.f32.xlu0 %v325_v53  ;;  %v112_v58 = vrot.slane %v75_v51, %v560_v12 }
  0xd4   :  { %v140_v3 = vsel %vm135_vm10, %v128_v57, %v139_v62 }
  0xd5   :  { %v90_v59 = vpop.xlane.xlu1 %89  ;;  %v136_v0 = vsel %vm135_vm10, %v112_v58, %v134_v61 }
  0xd6   :  { %v78_v60 = vpop.xlane.xlu0 %77  ;;  %v132_v63 = vrot.slane %v90_v59, %v560_v12 }
  0xd7   :  { %v116_v2 = vrot.slane %v78_v60, %v560_v12 }
  0xd8   :  { %v141_v4 = vsel %vm137_vm11, %v132_v63, %v140_v3 }
  0xd9   :  { %v138_v5 = vsel %vm137_vm11, %v116_v2, %v136_v0  ;;  %v148_v1 = vsel %vm144_vm12, %v141_v4, 0.0 }
  0xda   :  { %v145_v6 = vsel %vm144_vm12, %v138_v5, 0.0  ;;  %149 = vadd.xlane.f32.xlu1 %v148_v1 }
  0xdb   :  { %146 = vadd.xlane.f32.xlu0 %v145_v6 }
 0x157   :  { %v244_v7 = vpop.xlane.xlu1 %243 }
 0x158   :  { %v241_v8 = vpop.xlane.xlu0 %240 }
 0x15b   :  { %v330_v9 = vpop.xlane.xlu1 %329 }
 0x15c   :  { %v327_v10 = vpop.xlane.xlu0 %326  ;;  %v332_v11 = vadd.f32 %v330_v9, %v244_v7 }
 0x15d   :  { %v331_v13 = vadd.f32 %v327_v10, %v241_v8 }
 0x15e   :  { %v356_v14 = vrot.slane %v332_v11, %v560_v12 }
 0x15f   :  { %v352_v15 = vrot.slane %v331_v13, %v560_v12 }
 0x161   :  { %v357_v16 = vsel %vm133_vm9, %v356_v14, %v352_v15 }
 0x162   :  { %360 = vst.msk [vmem:[#allocation7 + $0x2] sm:$0x3] %vm345_vm13, %v357_v16 }
 0x163   :  { %v150_v17 = vpop.xlane.xlu1 %149 }
 0x164   :  { %v147_v18 = vpop.xlane.xlu0 %146  ;;  %v342_v19 = vrot.slane %v150_v17, %v560_v12 }
 0x165   :  { %v338_v20 = vrot.slane %v147_v18, %v560_v12 }
 0x167   :  { %v343_v21 = vsel %vm133_vm9, %v342_v19, %v338_v20 }
 0x168   :  { %346 = vst.msk [vmem:[#allocation7] sm:$0x3] %vm345_vm13, %v343_v21 }
 0x169   :  { %444 = shalt.err (!%p441_p0)
}
 0x16a   :  { %372 = dma.vmem_to_hbm [thread:$0]  %s367_s1, 64, %s624_s2, [#allocation4], %s460_s12, %s460_s12, %s461_s13  }
 0x16b   :  { %457 = dma.done.wait [#allocation4], 64  }
 0x16c   :  { %458 = vsyncadd [#allocation4], 4294967232 }
 0x16d   :  { %376 = vsyncpa [#allocation3], 1 }
 0x16e   :  { %377 = vsyncpa [#allocation6], 1 }
 0x16f   :  { %378 = vsyncpa [#allocation4], 1 }

</bundles_post_ra>
